<compile_context>
chip_gen: v5e
topology: v5e:2x2
jax: 0.10.0
libtpu: 0.0.40
codegen_flags: <defaults>
</compile_context>

<pallas_src>
import jax
import jax.numpy as jnp
from jax.experimental import pallas as pl
from jax.experimental.pallas import tpu as pltpu

IN_FEATURES = 28 * 28      # 784
OUT_FEATURES = 10
OUT_PAD = 128              # lane-dense MXU N dimension (weight padding only)
MAX_TB = 2048              # f32 x tile: 2048*784*4 ≈ 6.3 MiB per buffer
SMALL_BATCH = 128          # below this, plain XLA dot beats a tiny pallas_call
VMEM_LIMIT_BYTES = 32 << 20  # explicit: safe on v5e (128 MiB phys) and v7x (64 MiB phys)


def _round_up(n, m):
    return ((n + m - 1) // m) * m


def linear_kernel(x_ref, w_ref, b_ref, o_ref):
    # x_ref: (TB, 784) f32
    # w_ref: (784, 128) bf16  (columns 10..127 are zero padding)
    # b_ref: (1, 10)  f32
    # o_ref: (TB, 10) f32
    x_bf16 = x_ref[...].astype(jnp.bfloat16)          # in-kernel cast (hidden under DMA)
    acc = jnp.dot(x_bf16, w_ref[...],
                  preferred_element_type=jnp.float32)  # (TB, 128) f32 on MXU
    o_ref[...] = acc[:, :OUT_FEATURES] + b_ref[...]    # narrow HBM-facing store


def prepare_linear_params(weight, bias):
    """One-time prep of nn.Linear params.

    weight: (10, 784) f32 (PyTorch (out, in) layout) -> (784, 128) bf16, zero-padded N.
    bias:   (10,)     f32 -> (1, 10) f32.
    """
    w_t = jnp.zeros((IN_FEATURES, OUT_PAD), dtype=jnp.bfloat16)
    w_t = w_t.at[:, :OUT_FEATURES].set(weight.T.astype(jnp.bfloat16))
    b2d = bias.astype(jnp.float32).reshape(1, OUT_FEATURES)
    return w_t, b2d


def my_model_forward(x_nchw, w_t, b2d, *, force_pallas=False):
    """Forward of MyModel: flatten + Linear(784 -> 10).

    x_nchw: (B, 1, 28, 28) f32
    w_t:    (784, 128) bf16 prepared weight (see prepare_linear_params)
    b2d:    (1, 10)   f32 prepared bias
    returns (B, 10) f32
    """
    B = x_nchw.shape[0]
    x_flat = x_nchw.reshape(B, -1).astype(jnp.float32)            # (B, 784)

    if B < SMALL_BATCH and not force_pallas:
        # grid=(1,) pallas_call pays fixed launch/DMA setup for ~KBs of work.
        acc = jnp.dot(x_flat.astype(jnp.bfloat16), w_t,
                      preferred_element_type=jnp.float32)
        return acc[:, :OUT_FEATURES] + b2d

    # Batch tile: biggest that fits VMEM, but keep >= 2 grid steps when
    # possible so the "parallel" axis can shard across TensorCores (v7x).
    tb = min(MAX_TB, _round_up(max(pl.cdiv(B, 2), 8), 8))
    b_pad = _round_up(B, tb)
    if b_pad != B:
        x_flat = jnp.pad(x_flat, ((0, b_pad - B), (0, 0)))

    grid = (b_pad // tb,)
    cost = pl.CostEstimate(
        flops=2 * b_pad * IN_FEATURES * OUT_PAD,
        bytes_accessed=(b_pad * IN_FEATURES * 4           # x read (f32)
                        + IN_FEATURES * OUT_PAD * 2       # weight (bf16)
                        + b_pad * OUT_FEATURES * 4        # out write (f32)
                        + OUT_FEATURES * 4),              # bias
        transcendentals=0,
    )

    out = pl.pallas_call(
        linear_kernel,
        out_shape=jax.ShapeDtypeStruct((b_pad, OUT_FEATURES), jnp.float32),
        grid_spec=pl.GridSpec(
            grid=grid,
            in_specs=[
                pl.BlockSpec((tb, IN_FEATURES), lambda i: (i, 0)),
                # weight & bias are resident (index_map ignores i)
                pl.BlockSpec((IN_FEATURES, OUT_PAD), lambda i: (0, 0)),
                pl.BlockSpec((1, OUT_FEATURES), lambda i: (0, 0)),
            ],
            out_specs=pl.BlockSpec((tb, OUT_FEATURES), lambda i: (i, 0)),
        ),
        compiler_params=pltpu.CompilerParams(
            dimension_semantics=("parallel",),
            vmem_limit_bytes=VMEM_LIMIT_BYTES),
        cost_estimate=cost,
    )(x_flat, w_t, b2d)

    return out[:B]


if __name__ == "__main__":
    key = jax.random.PRNGKey(0)
    kx, kw, kb = jax.random.split(key, 3)

    B = 2
    x = jax.random.normal(kx, (B, 1, 28, 28), dtype=jnp.float32)
    weight = jax.random.normal(kw, (OUT_FEATURES, IN_FEATURES),
                               dtype=jnp.float32) * 0.02     # (10, 784)
    bias = jax.random.normal(kb, (OUT_FEATURES,), dtype=jnp.float32) * 0.02

    # One-time param prep (hoisted out of the per-call forward).
    w_t, b2d = prepare_linear_params(weight, bias)

    # Force the Pallas path so the kernel is actually exercised at B=2.
    out = my_model_forward(x, w_t, b2d, force_pallas=True)
    out = jax.block_until_ready(out)
    assert out.shape == (B, OUT_FEATURES)

    # Auto path (small-batch XLA fallback) must agree with the kernel path.
    out_fb = jax.block_until_ready(my_model_forward(x, w_t, b2d))
    assert jnp.allclose(out, out_fb, atol=1e-3, rtol=1e-3)

    # Reference with the same bf16-input / f32-accumulate math.
    x_flat = x.reshape(B, -1)
    ref_bf16 = jnp.dot(x_flat.astype(jnp.bfloat16),
                       weight.T.astype(jnp.bfloat16),
                       preferred_element_type=jnp.float32) + bias
    assert jnp.allclose(out, ref_bf16, atol=2e-2, rtol=2e-2)

    # Loose check against the full-f32 reference (bf16 rounding only).
    ref_f32 = x_flat @ weight.T + bias
    assert jnp.allclose(out, ref_f32, atol=5e-2, rtol=5e-2)

    print("KERNEL_OK")
</pallas_src>

<mosaic_0001>
module attributes {stable_mosaic.version = 11 : i64} {
  func.func @linear_kernel(%arg0: i32, %arg1: memref<8x784xf32, #tpu.memory_space<vmem>>, %arg2: memref<784x128xbf16, #tpu.memory_space<vmem>>, %arg3: memref<1x10xf32, #tpu.memory_space<vmem>>, %arg4: memref<8x10xf32, #tpu.memory_space<vmem>>) attributes {dimension_semantics = [#tpu.dimension_semantics<parallel>], iteration_bounds = array<i64: 1>, scalar_prefetch = 0 : i64, scratch_operands = 0 : i64, tpu.core_type = #tpu.core_type<tc>, window_params = [{transform_indices = @transform_0, window_bounds = array<i64: 8, 784>}, {pipeline_mode = #tpu.pipeline_mode<synchronous>, transform_indices = @transform_1, window_bounds = array<i64: 784, 128>}, {pipeline_mode = #tpu.pipeline_mode<synchronous>, transform_indices = @transform_2, window_bounds = array<i64: 1, 10>}, {transform_indices = @transform_3, window_bounds = array<i64: 8, 10>}]} {
    %c0 = arith.constant 0 : index
    %c0_0 = arith.constant 0 : index
    %0 = vector.load %arg1[%c0, %c0_0] : memref<8x784xf32, #tpu.memory_space<vmem>>, vector<8x784xf32>
    %1 = arith.truncf %0 : vector<8x784xf32> to vector<8x784xbf16>
    %c0_1 = arith.constant 0 : index
    %c0_2 = arith.constant 0 : index
    %2 = vector.load %arg2[%c0_1, %c0_2] : memref<784x128xbf16, #tpu.memory_space<vmem>>, vector<784x128xbf16>
    %cst = arith.constant dense<0.000000e+00> : vector<8x128xf32>
    %3 = tpu.matmul %1, %2, %cst {dimension_numbers = #tpu.dot_dimension_numbers<[1], [0], [0], [1], [0, 0, 1, 1], [], []>} : vector<8x784xbf16>, vector<784x128xbf16>, vector<8x128xf32> -> vector<8x128xf32>
    %4 = vector.extract_strided_slice %3 {offsets = [0, 0], sizes = [8, 10], strides = [1, 1]} : vector<8x128xf32> to vector<8x10xf32>
    %c0_3 = arith.constant 0 : index
    %c0_4 = arith.constant 0 : index
    %5 = vector.load %arg3[%c0_3, %c0_4] : memref<1x10xf32, #tpu.memory_space<vmem>>, vector<1x10xf32>
    %6 = vector.broadcast %5 : vector<1x10xf32> to vector<8x10xf32>
    %7 = arith.addf %4, %6 : vector<8x10xf32>
    %c0_5 = arith.constant 0 : index
    %c0_6 = arith.constant 0 : index
    %8 = vector.load %arg4[%c0_5, %c0_6] : memref<8x10xf32, #tpu.memory_space<vmem>>, vector<8x10xf32>
    tpu.vector_store %arg4[%c0_5, %c0_6], %7 {strides = array<i32>} : memref<8x10xf32, #tpu.memory_space<vmem>>, vector<8x10xf32>,
    return
  }
  func.func @transform_0(%arg0: i32) -> (i32, i32) {
    %c0_i32 = arith.constant 0 : i32
    %c0_i32_0 = arith.constant 0 : i32
    return %arg0, %c0_i32 : i32, i32
  }
  func.func @transform_1(%arg0: i32) -> (i32, i32) {
    %c0_i32 = arith.constant 0 : i32
    %c0_i32_0 = arith.constant 0 : i32
    %c0_i32_1 = arith.constant 0 : i32
    return %c0_i32, %c0_i32_0 : i32, i32
  }
  func.func @transform_2(%arg0: i32) -> (i32, i32) {
    %c0_i32 = arith.constant 0 : i32
    %c0_i32_0 = arith.constant 0 : i32
    %c0_i32_1 = arith.constant 0 : i32
    return %c0_i32, %c0_i32_0 : i32, i32
  }
  func.func @transform_3(%arg0: i32) -> (i32, i32) {
    %c0_i32 = arith.constant 0 : i32
    %c0_i32_0 = arith.constant 0 : i32
    return %arg0, %c0_i32 : i32, i32
  }
}

</mosaic_0001>

<bundles_post_ra>
// kernel: tpu_custom_call.1
= control target key start
LH: loop header
LB: loop body
LE: loop exit
PB: predicated region body
PF: predicated region fallthrough
CT: control target
= control target key end

     0   :  { %8 = vsyncpa [#allocation3], 0  ;;  %s939_s0 = inlined_call_operand.hbm [shape: f32[8,784], index: 0, kind: input, shape index: {}]   ;;  %s940_s1 = inlined_call_operand.hbm [shape: bf16[784,128], index: 1, kind: input, shape index: {}]   ;;  %s941_s2 = inlined_call_operand.vmem [shape: f32[1,10], index: 2, kind: input, shape index: {}]   ;;  %s942_s3 = inlined_call_operand.hbm [shape: f32[8,10], index: 3, kind: output, shape index: {}]  }
   0x1   :  { %9 = vsyncpa [#allocation6], 0 }
   0x2   :  { %10 = vsyncpa [#allocation4], 0  ;;  %s16_s14 = sshll.u32 %s939_s0, 4  ;;  %s902_s15 = smov [#allocation2]   ;;  %s17_s14 = int_to_ptr.hbm [resolvable:$true] %s16_s14 }
   0x3   :  { %s18_s16 = sshll.u32 %s902_s15, 4  ;;  %s26_s19 = sshll.u32 %s940_s1, 4  ;;  %s19_s16 = int_to_ptr.vmem [resolvable:$true] %s18_s16  ;;  %s27_s19 = int_to_ptr.hbm [resolvable:$true] %s26_s19 }
   0x4   :  { %21 = dma.hbm_to_vmem [thread:$0]  %s17_s14, 896, %s19_s16, [#allocation3]  }
   0x5   :  { %s903_s20 = smov [#allocation5]   ;;  %s904_s22 = smov 64  }
   0x6   :  { %s28_s21 = sshll.u32 %s903_s20, 4  ;;  %s905_s23 = smov 4   ;;  %s29_s21 = int_to_ptr.vmem [resolvable:$true] %s28_s21 }
   0x7   :  { %34 = dma.hbm_to_vmem [thread:$0]  %s27_s19, 6272, %s29_s21, [#allocation6], %s904_s22, %s904_s22, %s905_s23  }
   0x8   :  { %896 = dma.done.wait [#allocation3], 896  }
   0x9   :  { %897 = vsyncadd [#allocation3], 4294966400 }
   0xa   :  { %898 = dma.done.wait [#allocation6], 6272  }
   0xb   :  { %899 = vsyncadd [#allocation6], 4294961024  ;;  %v776_v0 = vld [vmem:[#allocation5 + $0x38] sm:$0xff]  ;;  %v775_v3 = vld [vmem:[#allocation5 + $0x30] sm:$0xff]  ;;  %vm452_vm0 = vcmask 130048   ;;  %s906_s24 = smov [#allocation7]  }
   0xc   :  { %v784_v1 = vld [vmem:[#allocation5 + $0x78] sm:$0xff]  ;;  %456 = vmatpush.bf16.msra.mxu0 %v776_v0  ;;  %v783_v4 = vld [vmem:[#allocation5 + $0x70] sm:$0xff]  ;;  %v774_v8 = vld [vmem:[#allocation5 + $0x28] sm:$0xff]  ;;  %s559_s25 = sshll.u32 %s906_s24, 4  ;;  %s561_s28 = sshll.u32 %s942_s3, 4  ;;  %vm552_vm1 = vcmask 80896   ;;  %s560_s25 = int_to_ptr.vmem [resolvable:$true] %s559_s25  ;;  %s562_s28 = int_to_ptr.hbm [resolvable:$true] %s561_s28 }
   0xd   :  { %v792_v2 = vld [vmem:[#allocation5 + $0xb8] sm:$0xff]  ;;  %469 = vmatpush.bf16.msra.mxu1 %v784_v1  ;;  %v791_v5 = vld [vmem:[#allocation5 + $0xb0] sm:$0xff]  ;;  %v782_v9 = vld [vmem:[#allocation5 + $0x68] sm:$0xff] }
   0xe   :  { %482 = vmatpush.bf16.msra.mxu2 %v792_v2  ;;  %v800_v6 = vld [vmem:[#allocation5 + $0xf8] sm:$0xff]  ;;  %v799_v7 = vld [vmem:[#allocation5 + $0xf0] sm:$0xff]  ;;  %v790_v10 = vld [vmem:[#allocation5 + $0xa8] sm:$0xff] }
   0xf   :  { %495 = vmatpush.bf16.msra.mxu3 %v800_v6  ;;  %v798_v11 = vld [vmem:[#allocation5 + $0xe8] sm:$0xff]  ;;  %v773_v12 = vld [vmem:[#allocation5 + $0x20] sm:$0xff]  ;;  %v772_v16 = vld [vmem:[#allocation5 + $0x18] sm:$0xff] }
  0x10   :  { %457 = vmatpush.bf16.msra.mxu0 %v775_v3  ;;  %v781_v13 = vld [vmem:[#allocation5 + $0x60] sm:$0xff]  ;;  %v780_v17 = vld [vmem:[#allocation5 + $0x58] sm:$0xff]  ;;  %v771_v20 = vld [vmem:[#allocation5 + $0x10] sm:$0xff] }
  0x11   :  { %470 = vmatpush.bf16.msra.mxu1 %v783_v4  ;;  %v789_v14 = vld [vmem:[#allocation5 + $0xa0] sm:$0xff]  ;;  %v788_v18 = vld [vmem:[#allocation5 + $0x98] sm:$0xff]  ;;  %v779_v21 = vld [vmem:[#allocation5 + $0x50] sm:$0xff] }
  0x12   :  { %483 = vmatpush.bf16.msra.mxu2 %v791_v5  ;;  %v797_v15 = vld [vmem:[#allocation5 + $0xe0] sm:$0xff]  ;;  %v796_v19 = vld [vmem:[#allocation5 + $0xd8] sm:$0xff]  ;;  %v787_v22 = vld [vmem:[#allocation5 + $0x90] sm:$0xff] }
  0x13   :  { %496 = vmatpush.bf16.msra.mxu3 %v799_v7  ;;  %v795_v23 = vld [vmem:[#allocation5 + $0xd0] sm:$0xff]  ;;  %v770_v24 = vld [vmem:[#allocation5 + $0x8] sm:$0xff]  ;;  %v769_v27 = vld [vmem:[#allocation5] sm:$0xff] }
  0x14   :  { %458 = vmatpush.bf16.msra.mxu0 %v774_v8  ;;  %v778_v25 = vld [vmem:[#allocation5 + $0x48] sm:$0xff]  ;;  %v777_v29 = vld [vmem:[#allocation5 + $0x40] sm:$0xff]  ;;  %v47_v31 = vld [vmem:[#allocation2 + $0x8] sm:$0xff] }
  0x15   :  { %471 = vmatpush.bf16.msra.mxu1 %v782_v9  ;;  %v786_v26 = vld [vmem:[#allocation5 + $0x88] sm:$0xff]  ;;  %v785_v32 = vld [vmem:[#allocation5 + $0x80] sm:$0xff]  ;;  %v808_v33 = vld [vmem:[#allocation5 + $0x138] sm:$0xff]  ;;  %v54_v38 = vpack.c.bf16 %v47_v31, %v47_v31 }
  0x16   :  { %484 = vmatpush.bf16.msra.mxu2 %v790_v10  ;;  %v794_v28 = vld [vmem:[#allocation5 + $0xc8] sm:$0xff]  ;;  %v48_v34 = vld [vmem:[#allocation2 + $0x10] sm:$0xff]  ;;  %v817_v36 = vld [vmem:[#allocation5 + $0x180] sm:$0xff] }
  0x17   :  { %497 = vmatpush.bf16.msra.mxu3 %v798_v11  ;;  %v46_v30 = vld [vmem:[#allocation2] sm:$0xff]  ;;  %v816_v35 = vld [vmem:[#allocation5 + $0x178] sm:$0xff]  ;;  %v55_v39 = vpack.c.bf16 %v48_v34, %v48_v34  ;;  %v793_v40 = vld [vmem:[#allocation5 + $0xc0] sm:$0xff] }
  0x18   :  { %459 = vmatpush.bf16.msra.mxu0 %v773_v12  ;;  %v53_v37 = vpack.c.bf16 %v46_v30, %v46_v30  ;;  %v49_v41 = vld [vmem:[#allocation2 + $0x18] sm:$0xff]  ;;  %v807_v42 = vld [vmem:[#allocation5 + $0x130] sm:$0xff]  ;;  %v806_v45 = vld [vmem:[#allocation5 + $0x128] sm:$0xff] }
  0x19   :  { %472 = vmatpush.bf16.msra.mxu1 %v781_v13  ;;  %v815_v43 = vld [vmem:[#allocation5 + $0x170] sm:$0xff]  ;;  %v56_v44 = vpack.c.bf16 %v49_v41, %v49_v41  ;;  %v814_v46 = vld [vmem:[#allocation5 + $0x168] sm:$0xff]  ;;  %v805_v47 = vld [vmem:[#allocation5 + $0x120] sm:$0xff] }
  0x1a   :  { %485 = vmatpush.bf16.msra.mxu2 %v789_v14  ;;  %v813_v48 = vld [vmem:[#allocation5 + $0x160] sm:$0xff]  ;;  %v804_v49 = vld [vmem:[#allocation5 + $0x118] sm:$0xff]  ;;  %v803_v53 = vld [vmem:[#allocation5 + $0x110] sm:$0xff] }
  0x1b   :  { %498 = vmatpush.bf16.msra.mxu3 %v797_v15  ;;  %v52_v50 = vld [vmem:[#allocation2 + $0x30] sm:$0xff]  ;;  %v811_v54 = vld [vmem:[#allocation5 + $0x150] sm:$0xff]  ;;  %v802_v55 = vld [vmem:[#allocation5 + $0x108] sm:$0xff] }
  0x1c   :  { %460 = vmatpush.bf16.msra.mxu0 %v772_v16  ;;  %v812_v51 = vld [vmem:[#allocation5 + $0x158] sm:$0xff]  ;;  %v59_v52 = vpack.c.bf16 %v52_v50, %v52_v50  ;;  %v810_v56 = vld [vmem:[#allocation5 + $0x148] sm:$0xff]  ;;  %v801_v57 = vld [vmem:[#allocation5 + $0x100] sm:$0xff] }
  0x1d   :  { %473 = vmatpush.bf16.msra.mxu1 %v780_v17  ;;  %v50_v58 = vld [vmem:[#allocation2 + $0x20] sm:$0xff]  ;;  %v809_v59 = vld [vmem:[#allocation5 + $0x140] sm:$0xff]  ;;  %v51_v60 = vld [vmem:[#allocation2 + $0x28] sm:$0xff] }
  0x1e   :  { %486 = vmatpush.bf16.msra.mxu2 %v788_v18  ;;  %v57_v61 = vpack.c.bf16 %v50_v58, %v50_v58  ;;  %v58_v62 = vpack.c.bf16 %v51_v60, %v51_v60  ;;  %v823_v16 = vld [vmem:[%s941_s2] ss:$0 sm:$0xff] }
  0x1f   :  { %499 = vmatpush.bf16.msra.mxu3 %v796_v19 }
  0x20   :  { %461 = vmatpush.bf16.msra.mxu0 %v771_v20 }
  0x21   :  { %474 = vmatpush.bf16.msra.mxu1 %v779_v21 }
  0x22   :  { %487 = vmatpush.bf16.msra.mxu2 %v787_v22 }
  0x23   :  { %500 = vmatpush.bf16.msra.mxu3 %v795_v23 }
  0x24   :  { %462 = vmatpush.bf16.msra.mxu0 %v770_v24 }
  0x25   :  { %475 = vmatpush.bf16.msra.mxu1 %v778_v25 }
  0x26   :  { %488 = vmatpush.bf16.msra.mxu2 %v786_v26 }
  0x27   :  { %501 = vmatpush.bf16.msra.mxu3 %v794_v28 }
  0x28   :  { %463 = vmatpush.bf16.msra.mxu0 %v769_v27 }
  0x29   :  { %476 = vmatpush.bf16.msra.mxu1 %v777_v29 }
  0x2a   :  { %489 = vmatpush.bf16.msra.mxu2 %v785_v32 }
  0x2b   :  { %464 = vmatmul.bf16.vlgmr.msra.gmra.mxu0 %v53_v37  ;;  %502 = vmatpush.bf16.msra.mxu3 %v793_v40 }
  0x2c   :  { %508 = vmatpush.bf16.msrb.mxu0 %v808_v33  ;;  %477 = vmatmul.bf16.vlgmr.msra.gmra.mxu1 %v54_v38 }
  0x2d   :  { %521 = vmatpush.bf16.msrb.mxu1 %v816_v35  ;;  %490 = vmatmul.bf16.vlgmr.msra.gmra.mxu2 %v55_v39 }
  0x2e   :  { %541 = vmatpush.bf16.msrb.mxu2 %v817_v36  ;;  %503 = vmatmul.bf16.vlgmr.msra.gmra.mxu3 %v56_v44 }
  0x30   :  { %509 = vmatpush.bf16.msrb.mxu0 %v807_v42 }
  0x31   :  { %522 = vmatpush.bf16.msrb.mxu1 %v815_v43 }
  0x34   :  { %510 = vmatpush.bf16.msrb.mxu0 %v806_v45 }
  0x35   :  { %523 = vmatpush.bf16.msrb.mxu1 %v814_v46 }
  0x38   :  { %511 = vmatpush.bf16.msrb.mxu0 %v805_v47 }
  0x39   :  { %524 = vmatpush.bf16.msrb.mxu1 %v813_v48 }
  0x3c   :  { %512 = vmatpush.bf16.msrb.mxu0 %v804_v49 }
  0x3d   :  { %525 = vmatpush.bf16.msrb.mxu1 %v812_v51  ;;  %768 = vmatmul.msk.bf16.vlgmr.msrb.gmra.mxu2 %vm452_vm0, %v59_v52 }
  0x40   :  { %513 = vmatpush.bf16.msrb.mxu0 %v803_v53 }
  0x41   :  { %526 = vmatpush.bf16.msrb.mxu1 %v811_v54 }
  0x44   :  { %514 = vmatpush.bf16.msrb.mxu0 %v802_v55 }
  0x45   :  { %527 = vmatpush.bf16.msrb.mxu1 %v810_v56 }
  0x48   :  { %515 = vmatpush.bf16.msrb.mxu0 %v801_v57 }
  0x49   :  { %528 = vmatpush.bf16.msrb.mxu1 %v809_v59 }
  0x4b   :  { %516 = vmatmul.bf16.vlgmr.msrb.gmra.mxu0 %v57_v61 }
  0x4c   :  { %529 = vmatmul.bf16.vlgmr.msrb.gmra.mxu1 %v58_v62 }
  0xa8   :  { %v465_v63 = vpop.f32.mrf.mxu0 }
  0xa9   :  { %v478_v0 = vpop.f32.mrf.mxu1 }
  0xaa   :  { %v479_v7 = vadd.f32 %v478_v0, %v465_v63 }
  0xb0   :  { %v491_v1 = vpop.f32.mrf.mxu2  ;;  %v467_v2 = vpop.f32.mrf.mxu0 }
  0xb1   :  { %v480_v3 = vpop.f32.mrf.mxu1  ;;  %v504_v4 = vpop.f32.mrf.mxu3  ;;  %v492_v9 = vadd.f32 %v491_v1, %v479_v7 }
  0xb3   :  { %v505_v10 = vadd.f32 %v504_v4, %v492_v9 }
  0xb8   :  { %v493_v5 = vpop.f32.mrf.mxu2 }
  0xb9   :  { %v506_v6 = vpop.f32.mrf.mxu3 }
  0xc0   :  { %v543_v8 = vpop.f32.mrf.mxu2 }
  0xc8   :  { %v517_v11 = vpop.f32.mrf.mxu0  ;;  %v545_v14 = vpop.f32.mrf.mxu2 }
  0xc9   :  { %v518_v12 = vadd.f32 %v517_v11, %v505_v10  ;;  %v530_v13 = vpop.f32.mrf.mxu1 }
  0xcb   :  { %v531_v15 = vadd.f32 %v530_v13, %v518_v12 }
  0xcd   :  { %v544_v17 = vadd.f32 %v543_v8, %v531_v15 }
  0xcf   :  { %v551_v18 = vadd.f32 %v823_v16, %v544_v17 }
  0xd0   :  { %v519_v19 = vpop.f32.mrf.mxu0 }
  0xd1   :  { %v532_v20 = vpop.f32.mrf.mxu1  ;;  %553 = vst.msk [vmem:[#allocation7] sm:$0xff] %vm552_vm1, %v551_v18 }
  0xd2   :  { %564 = dma.vmem_to_hbm [thread:$0]  %s560_s25, 128, %s562_s28, [#allocation4]  }
  0xd3   :  { %900 = dma.done.wait [#allocation4], 128  }
  0xd4   :  { %901 = vsyncadd [#allocation4], 4294967168 }
  0xd5   :  { %569 = vsyncpa [#allocation3], 1 }
  0xd6   :  { %570 = vsyncpa [#allocation6], 1 }
  0xd7   :  { %571 = vsyncpa [#allocation4], 1 }

</bundles_post_ra>
